<compile_context>
chip_gen: v6e
topology: v6e:2x2x1
jax: 0.10.0
libtpu: 0.0.40
codegen_flags: <defaults>
</compile_context>

<pallas_src>
import jax
import jax.numpy as jnp
import numpy as np
from jax.experimental import pallas as pl
from jax.experimental.pallas import tpu as pltpu


HIDDEN = 256       # layer_sizes = [256, 256]
OUT_PAD = 128      # lane-dense padding of the N=1 output
LANES = 128


# ----------------------------------------------------------------------------
# Pallas kernel: fused 3-layer MLP over one batch tile.
#   x_ref  : (TB, Dp)   bf16
#   w1_ref : (Dp, 256)  bf16     b1_ref : (1, 256) f32
#   w2_ref : (256, 256) bf16     b2_ref : (1, 256) f32
#   w3_ref : (256, 128) bf16     (only column 0 is the real weight, rest zero)
#   o_ref  : (TB, 128)  f32      (column 0 is the real output)
# ----------------------------------------------------------------------------
def _td_mlp_kernel(x_ref, w1_ref, b1_ref, w2_ref, b2_ref, w3_ref, o_ref):
    x = x_ref[...]                                                       # (TB, Dp) bf16
    h1 = jnp.dot(x, w1_ref[...], preferred_element_type=jnp.float32)     # MXU, f32 acc
    h1 = jnp.maximum(h1 + b1_ref[...], 0.0)                              # f32 bias + ReLU
    h2 = jnp.dot(h1.astype(jnp.bfloat16), w2_ref[...],
                 preferred_element_type=jnp.float32)
    h2 = jnp.maximum(h2 + b2_ref[...], 0.0)
    out = jnp.dot(h2.astype(jnp.bfloat16), w3_ref[...],
                  preferred_element_type=jnp.float32)                    # (TB, 128)
    o_ref[...] = out


def td_network_forward(x, params, *, block_b=512):
    """Fused forward pass of TDNetwork. x: (B, D) float32 -> (B, 1) float32."""
    (w1, b1), (w2, b2), (w3, b3) = params  # w_i in (in, out) layout, f32
    B, D = x.shape
    H = w1.shape[1]

    # --- pad feature dim up to a multiple of 128 lanes ---------------------
    D_pad = max(LANES, ((D + LANES - 1) // LANES) * LANES)
    if D_pad != D:
        x_p = jnp.zeros((B, D_pad), x.dtype).at[:, :D].set(x)
        w1_p = jnp.zeros((D_pad, H), w1.dtype).at[:D, :].set(w1)
    else:
        x_p, w1_p = x, w1

    # --- pad the N=1 output layer to 128 lanes (lane-dense stores) ---------
    w3_p = jnp.zeros((H, OUT_PAD), w3.dtype).at[:, :1].set(w3)

    # --- bf16 MXU inputs (cast once, outside the grid loop) ----------------
    x_bf = x_p.astype(jnp.bfloat16)
    w1_bf = w1_p.astype(jnp.bfloat16)
    w2_bf = w2.astype(jnp.bfloat16)
    w3_bf = w3_p.astype(jnp.bfloat16)
    b1_f = b1.astype(jnp.float32)
    b2_f = b2.astype(jnp.float32)

    # --- batch tiling -------------------------------------------------------
    if B <= block_b:
        TB = B                       # single step, block == full batch dim
        B_pad = B
    else:
        TB = block_b
        B_pad = pl.cdiv(B, TB) * TB
        if B_pad != B:
            x_bf = jnp.zeros((B_pad, D_pad), jnp.bfloat16).at[:B, :].set(x_bf)
    grid = (B_pad // TB,)

    out_padded = pl.pallas_call(
        _td_mlp_kernel,
        out_shape=jax.ShapeDtypeStruct((B_pad, OUT_PAD), jnp.float32),
        grid=grid,
        in_specs=[
            pl.BlockSpec((TB, D_pad), lambda i: (i, 0)),     # x tile (pipelined)
            pl.BlockSpec((D_pad, H), lambda i: (0, 0)),      # w1 (resident)
            pl.BlockSpec((1, H), lambda i: (0, 0)),          # b1 (resident)
            pl.BlockSpec((H, H), lambda i: (0, 0)),          # w2 (resident)
            pl.BlockSpec((1, H), lambda i: (0, 0)),          # b2 (resident)
            pl.BlockSpec((H, OUT_PAD), lambda i: (0, 0)),    # w3 padded (resident)
        ],
        out_specs=pl.BlockSpec((TB, OUT_PAD), lambda i: (i, 0)),
        compiler_params=pltpu.CompilerParams(
            dimension_semantics=("parallel",)),              # v7x: 2 TCs; no-op on v5e/v6e
    )(x_bf, w1_bf, b1_f, w2_bf, b2_f, w3_bf)

    # slice the real column, drop batch padding, fold in the scalar final bias
    return out_padded[:B, :1] + b3.astype(jnp.float32)


# ----------------------------------------------------------------------------
# Deterministic parameter initialization (mirrors nn.init.orthogonal_(gain=sqrt(2)))
# ----------------------------------------------------------------------------
def _orthogonal(key, out_features, in_features, gain):
    rows, cols = out_features, in_features
    a = jax.random.normal(key, (max(rows, cols), min(rows, cols)), dtype=jnp.float32)
    q, r = jnp.linalg.qr(a)
    q = q * jnp.sign(jnp.diag(r))            # make decomposition unique
    if rows < cols:
        q = q.T
    return gain * q[:rows, :cols]            # (out_features, in_features)


def init_td_network_params(key, state_dim, action_dim, net_type="Q"):
    input_size = state_dim + action_dim if net_type == "Q" else state_dim
    layer_sizes = [input_size, HIDDEN, HIDDEN, 1]
    gain = float(np.sqrt(2.0))
    params = []
    for i in range(3):
        key, wk, bk = jax.random.split(key, 3)
        fan_in, fan_out = layer_sizes[i], layer_sizes[i + 1]
        w = _orthogonal(wk, fan_out, fan_in, gain)            # (out, in), torch layout
        bound = 1.0 / np.sqrt(fan_in)                         # torch Linear default bias init
        b = jax.random.uniform(bk, (1, fan_out), jnp.float32, -bound, bound)
        # pre-transpose weight to (in, out) so the kernel does x @ W + b
        params.append((w.T, b))
    return params


def _reference_forward_f32(x, params):
    h = x
    for i, (w, b) in enumerate(params):
        h = h @ w + b
        if i < len(params) - 1:
            h = jnp.maximum(h, 0.0)
    return h


def _reference_forward_bf16(x, params):
    """Reference matching the kernel's bf16-input / f32-accumulate math."""
    h = x
    for i, (w, b) in enumerate(params):
        h = jnp.dot(h.astype(jnp.bfloat16), w.astype(jnp.bfloat16),
                    preferred_element_type=jnp.float32) + b
        if i < len(params) - 1:
            h = jnp.maximum(h, 0.0)
    return h


if __name__ == "__main__":
    state_dim, action_dim = 24, 8
    net_type = "Q"                       # input = concat(state, action) -> D = 32
    B = 8
    D = state_dim + action_dim

    key = jax.random.PRNGKey(0)
    pkey, xkey = jax.random.split(key)
    params = init_td_network_params(pkey, state_dim, action_dim, net_type)
    x = jax.random.normal(xkey, (B, D), dtype=jnp.float32)   # concat(state, action)

    out = td_network_forward(x, params)
    out = jax.block_until_ready(out)

    ref_bf16 = _reference_forward_bf16(x, params)   # same math as the kernel
    ref_f32 = _reference_forward_f32(x, params)     # full-precision PyTorch-equivalent math
    assert out.shape == (B, 1)
    assert jnp.allclose(out, ref_bf16, atol=1e-3, rtol=1e-3)
    assert jnp.allclose(out, ref_f32, atol=5e-2, rtol=5e-2)

    print("KERNEL_OK")
</pallas_src>

<mosaic_0001>
module attributes {stable_mosaic.version = 11 : i64} {
  func.func @_td_mlp_kernel(%arg0: i32, %arg1: memref<8x128xbf16, #tpu.memory_space<vmem>>, %arg2: memref<128x256xbf16, #tpu.memory_space<vmem>>, %arg3: memref<1x256xf32, #tpu.memory_space<vmem>>, %arg4: memref<256x256xbf16, #tpu.memory_space<vmem>>, %arg5: memref<1x256xf32, #tpu.memory_space<vmem>>, %arg6: memref<256x128xbf16, #tpu.memory_space<vmem>>, %arg7: memref<8x128xf32, #tpu.memory_space<vmem>>) attributes {dimension_semantics = [#tpu.dimension_semantics<parallel>], iteration_bounds = array<i64: 1>, scalar_prefetch = 0 : i64, scratch_operands = 0 : i64, tpu.core_type = #tpu.core_type<tc>, window_params = [{transform_indices = @transform_0, window_bounds = array<i64: 8, 128>}, {pipeline_mode = #tpu.pipeline_mode<synchronous>, transform_indices = @transform_1, window_bounds = array<i64: 128, 256>}, {pipeline_mode = #tpu.pipeline_mode<synchronous>, transform_indices = @transform_2, window_bounds = array<i64: 1, 256>}, {pipeline_mode = #tpu.pipeline_mode<synchronous>, transform_indices = @transform_3, window_bounds = array<i64: 256, 256>}, {pipeline_mode = #tpu.pipeline_mode<synchronous>, transform_indices = @transform_4, window_bounds = array<i64: 1, 256>}, {pipeline_mode = #tpu.pipeline_mode<synchronous>, transform_indices = @transform_5, window_bounds = array<i64: 256, 128>}, {transform_indices = @transform_6, window_bounds = array<i64: 8, 128>}]} {
    %c0 = arith.constant 0 : index
    %c0_0 = arith.constant 0 : index
    %0 = vector.load %arg1[%c0, %c0_0] : memref<8x128xbf16, #tpu.memory_space<vmem>>, vector<8x128xbf16>
    %c0_1 = arith.constant 0 : index
    %c0_2 = arith.constant 0 : index
    %1 = vector.load %arg2[%c0_1, %c0_2] : memref<128x256xbf16, #tpu.memory_space<vmem>>, vector<128x256xbf16>
    %cst = arith.constant dense<0.000000e+00> : vector<8x256xf32>
    %2 = tpu.matmul %0, %1, %cst {dimension_numbers = #tpu.dot_dimension_numbers<[1], [0], [0], [1], [0, 0, 1, 1], [], []>} : vector<8x128xbf16>, vector<128x256xbf16>, vector<8x256xf32> -> vector<8x256xf32>
    %c0_3 = arith.constant 0 : index
    %c0_4 = arith.constant 0 : index
    %3 = vector.load %arg3[%c0_3, %c0_4] : memref<1x256xf32, #tpu.memory_space<vmem>>, vector<1x256xf32>
    %4 = vector.broadcast %3 : vector<1x256xf32> to vector<8x256xf32>
    %5 = arith.addf %2, %4 : vector<8x256xf32>
    %cst_5 = arith.constant 0.000000e+00 : f32
    %6 = vector.broadcast %cst_5 : f32 to vector<8x256xf32>
    %7 = arith.maximumf %5, %6 : vector<8x256xf32>
    %8 = arith.truncf %7 : vector<8x256xf32> to vector<8x256xbf16>
    %c0_6 = arith.constant 0 : index
    %c0_7 = arith.constant 0 : index
    %9 = vector.load %arg4[%c0_6, %c0_7] : memref<256x256xbf16, #tpu.memory_space<vmem>>, vector<256x256xbf16>
    %cst_8 = arith.constant dense<0.000000e+00> : vector<8x256xf32>
    %10 = tpu.matmul %8, %9, %cst_8 {dimension_numbers = #tpu.dot_dimension_numbers<[1], [0], [0], [1], [0, 0, 1, 1], [], []>} : vector<8x256xbf16>, vector<256x256xbf16>, vector<8x256xf32> -> vector<8x256xf32>
    %c0_9 = arith.constant 0 : index
    %c0_10 = arith.constant 0 : index
    %11 = vector.load %arg5[%c0_9, %c0_10] : memref<1x256xf32, #tpu.memory_space<vmem>>, vector<1x256xf32>
    %12 = vector.broadcast %11 : vector<1x256xf32> to vector<8x256xf32>
    %13 = arith.addf %10, %12 : vector<8x256xf32>
    %cst_11 = arith.constant 0.000000e+00 : f32
    %14 = vector.broadcast %cst_11 : f32 to vector<8x256xf32>
    %15 = arith.maximumf %13, %14 : vector<8x256xf32>
    %16 = arith.truncf %15 : vector<8x256xf32> to vector<8x256xbf16>
    %c0_12 = arith.constant 0 : index
    %c0_13 = arith.constant 0 : index
    %17 = vector.load %arg6[%c0_12, %c0_13] : memref<256x128xbf16, #tpu.memory_space<vmem>>, vector<256x128xbf16>
    %cst_14 = arith.constant dense<0.000000e+00> : vector<8x128xf32>
    %18 = tpu.matmul %16, %17, %cst_14 {dimension_numbers = #tpu.dot_dimension_numbers<[1], [0], [0], [1], [0, 0, 1, 1], [], []>} : vector<8x256xbf16>, vector<256x128xbf16>, vector<8x128xf32> -> vector<8x128xf32>
    %c0_15 = arith.constant 0 : index
    %c0_16 = arith.constant 0 : index
    %19 = vector.load %arg7[%c0_15, %c0_16] : memref<8x128xf32, #tpu.memory_space<vmem>>, vector<8x128xf32>
    tpu.vector_store %arg7[%c0_15, %c0_16], %18 {strides = array<i32>} : memref<8x128xf32, #tpu.memory_space<vmem>>, vector<8x128xf32>,
    return
  }
  func.func @transform_0(%arg0: i32) -> (i32, i32) {
    %c0_i32 = arith.constant 0 : i32
    %c0_i32_0 = arith.constant 0 : i32
    return %arg0, %c0_i32 : i32, i32
  }
  func.func @transform_1(%arg0: i32) -> (i32, i32) {
    %c0_i32 = arith.constant 0 : i32
    %c0_i32_0 = arith.constant 0 : i32
    %c0_i32_1 = arith.constant 0 : i32
    return %c0_i32, %c0_i32_0 : i32, i32
  }
  func.func @transform_2(%arg0: i32) -> (i32, i32) {
    %c0_i32 = arith.constant 0 : i32
    %c0_i32_0 = arith.constant 0 : i32
    %c0_i32_1 = arith.constant 0 : i32
    return %c0_i32, %c0_i32_0 : i32, i32
  }
  func.func @transform_3(%arg0: i32) -> (i32, i32) {
    %c0_i32 = arith.constant 0 : i32
    %c0_i32_0 = arith.constant 0 : i32
    %c0_i32_1 = arith.constant 0 : i32
    return %c0_i32, %c0_i32_0 : i32, i32
  }
  func.func @transform_4(%arg0: i32) -> (i32, i32) {
    %c0_i32 = arith.constant 0 : i32
    %c0_i32_0 = arith.constant 0 : i32
    %c0_i32_1 = arith.constant 0 : i32
    return %c0_i32, %c0_i32_0 : i32, i32
  }
  func.func @transform_5(%arg0: i32) -> (i32, i32) {
    %c0_i32 = arith.constant 0 : i32
    %c0_i32_0 = arith.constant 0 : i32
    %c0_i32_1 = arith.constant 0 : i32
    return %c0_i32, %c0_i32_0 : i32, i32
  }
  func.func @transform_6(%arg0: i32) -> (i32, i32) {
    %c0_i32 = arith.constant 0 : i32
    %c0_i32_0 = arith.constant 0 : i32
    return %arg0, %c0_i32 : i32, i32
  }
}

</mosaic_0001>

<bundles_post_ra>
// kernel: tpu_custom_call.1
= control target key start
LH: loop header
LB: loop body
LE: loop exit
PB: predicated region body
PF: predicated region fallthrough
CT: control target
= control target key end

     0   :  { %11 = vsyncpa [#allocation3], 0  ;;  %s1025_s0 = inlined_call_operand.hbm [shape: bf16[8,128], index: 0, kind: input, shape index: {}]   ;;  %s1026_s1 = inlined_call_operand.hbm [shape: bf16[128,256], index: 1, kind: input, shape index: {}]   ;;  %s1027_s2 = inlined_call_operand.vmem [shape: f32[1,256], index: 2, kind: input, shape index: {}]   ;;  %s1028_s3 = inlined_call_operand.hbm [shape: bf16[256,256], index: 3, kind: input, shape index: {}]   ;;  %s1029_s4 = inlined_call_operand.vmem [shape: f32[1,256], index: 4, kind: input, shape index: {}]   ;;  %s1030_s5 = inlined_call_operand.hbm [shape: bf16[256,128], index: 5, kind: input, shape index: {}]   ;;  %s1031_s6 = inlined_call_operand.hbm [shape: f32[8,128], index: 6, kind: output, shape index: {}]  }
   0x1   :  { %12 = vsyncpa [#allocation6], 0 }
   0x2   :  { %13 = vsyncpa [#allocation9], 0 }
   0x3   :  { %14 = vsyncpa [#allocation4], 0  ;;  %s959_s21 = smov [#allocation5]  }
   0x4   :  { %s30_s22 = sshll.u32 %s959_s21, 4  ;;  %s31_s22 = int_to_ptr.vmem [resolvable:$true] %s30_s22 }
   0x5   :  { %s859_s23 = scalar_lea.vmem %s31_s22, 2048  ;;  %p864_p1 = scmp.lt.s32.totalorder %s31_s22, %s31_s22 }
   0x6   :  { %p860_p0 = scmp.ne.s32.totalorder %s31_s22, %s859_s23  ;;  %p865_p2 = scmp.lt.s32.totalorder %s859_s23, %s859_s23 }
   0x8   :  { %p866_p3 = por %p865_p2, %p864_p1 }
   0xa   :  { %p867_p4 = pnand %p866_p3, %p860_p0 }
   0xc   :  { %870 = shalt.err (!%p867_p4)
}
   0xd   :  { %s960_s24 = smov 128   ;;  %s961_s25 = smov 8  }
   0xe   :  { %36 = dma.hbm_to_vmem [thread:$0]  %s1026_s1, 2048, %s31_s22, [#allocation6], %s960_s24, %s960_s24, %s961_s25  }
   0xf   :  { %s962_s28 = smov [#allocation2]   ;;  %s963_s30 = smov [#allocation7]  }
  0x10   :  { %s21_s29 = sshll.u32 %s962_s28, 4  ;;  %s44_s7 = sshll.u32 %s963_s30, 4  ;;  %s22_s29 = int_to_ptr.vmem [resolvable:$true] %s21_s29  ;;  %s45_s7 = int_to_ptr.vmem [resolvable:$true] %s44_s7 }
  0x11   :  { %s879_s8 = scalar_lea.vmem %s22_s29, 64  ;;  %p884_p6 = scmp.lt.s32.totalorder %s22_s29, %s22_s29 }
  0x12   :  { %p880_p5 = scmp.ne.s32.totalorder %s22_s29, %s879_s8  ;;  %p885_p7 = scmp.lt.s32.totalorder %s879_s8, %s879_s8 }
  0x14   :  { %p886_p8 = por %p885_p7, %p884_p6 }
  0x16   :  { %p887_p9 = pnand %p886_p8, %p880_p5 }
  0x18   :  { %890 = shalt.err (!%p887_p9)
}
  0x19   :  { %24 = dma.hbm_to_vmem [thread:$0]  %s1025_s0, 64, %s22_s29, [#allocation3]  }
  0x1a   :  { %s899_s11 = scalar_lea.vmem %s45_s7, 4096  ;;  %p904_p11 = scmp.lt.s32.totalorder %s45_s7, %s45_s7 }
  0x1b   :  { %p900_p10 = scmp.ne.s32.totalorder %s45_s7, %s899_s11  ;;  %p905_p12 = scmp.lt.s32.totalorder %s899_s11, %s899_s11 }
  0x1d   :  { %p906_p13 = por %p905_p12, %p904_p11 }
  0x1f   :  { %p907_p0 = pnand %p906_p13, %p900_p10 }
  0x21   :  { %910 = shalt.err (!%p907_p0)
}
  0x22   :  { %50 = dma.hbm_to_vmem [thread:$0]  %s1028_s3, 4096, %s45_s7, [#allocation6], %s960_s24, %s960_s24, %s961_s25  }
  0x23   :  { %s964_s13 = smov [#allocation8]  }
  0x24   :  { %s58_s14 = sshll.u32 %s964_s13, 4  ;;  %s59_s14 = int_to_ptr.vmem [resolvable:$true] %s58_s14 }
  0x25   :  { %s919_s15 = scalar_lea.vmem %s59_s14, 2048  ;;  %p924_p2 = scmp.lt.s32.totalorder %s59_s14, %s59_s14 }
  0x26   :  { %p920_p1 = scmp.ne.s32.totalorder %s59_s14, %s919_s15  ;;  %p925_p3 = scmp.lt.s32.totalorder %s919_s15, %s919_s15 }
  0x28   :  { %p926_p4 = por %p925_p3, %p924_p2 }
  0x2a   :  { %p927_p5 = pnand %p926_p4, %p920_p1 }
  0x2c   :  { %930 = shalt.err (!%p927_p5)
}
  0x2d   :  { %s965_s0 = smov 64   ;;  %s966_s16 = smov 4  }
  0x2e   :  { %64 = dma.hbm_to_vmem [thread:$0]  %s1030_s5, 2048, %s59_s14, [#allocation9], %s965_s0, %s965_s0, %s966_s16  }
  0x2f   :  { %951 = dma.done.wait [#allocation3], 64  }
  0x30   :  { %952 = vsyncadd [#allocation3], 4294967232 }
  0x31   :  { %953 = dma.done.wait [#allocation6], 6144  }
  0x32   :  { %954 = vsyncadd [#allocation6], 4294961152 }
  0x33   :  { %955 = dma.done.wait [#allocation9], 2048  }
  0x34   :  { %956 = vsyncadd [#allocation9], 4294965248  ;;  %v967_v0 = vmov 0   ;;  %v763_v1 = vld [vmem:[#allocation5 + $0x74] ss:$8 sps:$4 sm:$0xff]   ;;  %v839_v54 = vld [vmem:[#allocation8 + $0x68] sm:$0xff]   ;;  %v97_v62 = vlaneseq }
  0x35   :  { %219 = vmatprep.mubr.bf16.mxu0 %v967_v0  ;;  %v765_v2 = vld [vmem:[#allocation5 + $0x70] ss:$8 sps:$4 sm:$0xff]   ;;  %187 = vmatprep.subr.bf16.mxu0 %v763_v1  ;;  %v766_v3 = vld [vmem:[#allocation5 + $0x64] ss:$8 sps:$4 sm:$0xff]   ;;  %v768_v4 = vld [vmem:[#allocation5 + $0x60] ss:$8 sps:$4 sm:$0xff]  }
  0x36   :  { %188 = vmatpush1.bf16.msra.mxu0 %v765_v2  ;;  %v769_v5 = vld [vmem:[#allocation5 + $0x54] ss:$8 sps:$4 sm:$0xff]   ;;  %v771_v6 = vld [vmem:[#allocation5 + $0x50] ss:$8 sps:$4 sm:$0xff]   ;;  %v772_v7 = vld [vmem:[#allocation5 + $0x44] ss:$8 sps:$4 sm:$0xff]  }
  0x37   :  { %189 = vmatprep.subr.bf16.mxu0 %v766_v3  ;;  %v774_v8 = vld [vmem:[#allocation5 + $0x40] ss:$8 sps:$4 sm:$0xff]   ;;  %v775_v9 = vld [vmem:[#allocation5 + $0x34] ss:$8 sps:$4 sm:$0xff]   ;;  %v789_v11 = vld [vmem:[#allocation7 + $0x70] ss:$8 sps:$4 sm:$0xff]  }
  0x38   :  { %v787_v10 = vld [vmem:[#allocation7 + $0x74] ss:$8 sps:$4 sm:$0xff]   ;;  %v790_v12 = vld [vmem:[#allocation7 + $0x64] ss:$8 sps:$4 sm:$0xff]   ;;  %v777_v13 = vld [vmem:[#allocation5 + $0x30] ss:$8 sps:$4 sm:$0xff]  }
  0x39   :  { %436 = vmatprep.subr.bf16.mxu1 %v787_v10  ;;  %v792_v14 = vld [vmem:[#allocation7 + $0x60] ss:$8 sps:$4 sm:$0xff]   ;;  %v793_v15 = vld [vmem:[#allocation7 + $0x54] ss:$8 sps:$4 sm:$0xff]   ;;  %v778_v16 = vld [vmem:[#allocation5 + $0x24] ss:$8 sps:$4 sm:$0xff]  }
  0x3a   :  { %190 = vmatpush1.bf16.msra.mxu0 %v768_v4  ;;  %437 = vmatpush1.bf16.msra.mxu1 %v789_v11  ;;  %v780_v17 = vld [vmem:[#allocation5 + $0x20] ss:$8 sps:$4 sm:$0xff]   ;;  %v795_v18 = vld [vmem:[#allocation7 + $0x50] ss:$8 sps:$4 sm:$0xff]   ;;  %v796_v19 = vld [vmem:[#allocation7 + $0x44] ss:$8 sps:$4 sm:$0xff]  }
  0x3b   :  { %191 = vmatprep.subr.bf16.mxu0 %v769_v5  ;;  %438 = vmatprep.subr.bf16.mxu1 %v790_v12  ;;  %v781_v20 = vld [vmem:[#allocation5 + $0x14] ss:$8 sps:$4 sm:$0xff]   ;;  %v783_v21 = vld [vmem:[#allocation5 + $0x10] ss:$8 sps:$4 sm:$0xff]   ;;  %v798_v22 = vld [vmem:[#allocation7 + $0x40] ss:$8 sps:$4 sm:$0xff]  }
  0x3c   :  { %v799_v23 = vld [vmem:[#allocation7 + $0x34] ss:$8 sps:$4 sm:$0xff]   ;;  %v784_v24 = vld [vmem:[#allocation5 + $0x4] ss:$8 sps:$4 sm:$0xff]   ;;  %v786_v25 = vld [vmem:[#allocation5] ss:$8 sps:$4 sm:$0xff]  }
  0x3d   :  { %v801_v26 = vld [vmem:[#allocation7 + $0x30] ss:$8 sps:$4 sm:$0xff]   ;;  %v802_v27 = vld [vmem:[#allocation7 + $0x24] ss:$8 sps:$4 sm:$0xff]   ;;  %v78_v28 = vld [vmem:[#allocation2] sm:$0xf] }
  0x3e   :  { %192 = vmatpush1.bf16.msra.mxu0 %v771_v6  ;;  %439 = vmatpush1.bf16.msra.mxu1 %v792_v14  ;;  %v804_v29 = vld [vmem:[#allocation7 + $0x20] ss:$8 sps:$4 sm:$0xff]   ;;  %v805_v30 = vld [vmem:[#allocation7 + $0x14] ss:$8 sps:$4 sm:$0xff]   ;;  %v807_v31 = vld [vmem:[#allocation7 + $0x10] ss:$8 sps:$4 sm:$0xff]  }
  0x3f   :  { %193 = vmatprep.subr.bf16.mxu0 %v772_v7  ;;  %440 = vmatprep.subr.bf16.mxu1 %v793_v15  ;;  %v808_v32 = vld [vmem:[#allocation7 + $0x4] ss:$8 sps:$4 sm:$0xff]   ;;  %v810_v33 = vld [vmem:[#allocation7] ss:$8 sps:$4 sm:$0xff]   ;;  %v811_v34 = vld [vmem:[#allocation7 + $0xf4] ss:$8 sps:$4 sm:$0xff]  }
  0x40   :  { %v813_v35 = vld [vmem:[#allocation7 + $0xf0] ss:$8 sps:$4 sm:$0xff]   ;;  %v814_v36 = vld [vmem:[#allocation7 + $0xe4] ss:$8 sps:$4 sm:$0xff]   ;;  %v816_v37 = vld [vmem:[#allocation7 + $0xe0] ss:$8 sps:$4 sm:$0xff]  }
  0x41   :  { %v817_v38 = vld [vmem:[#allocation7 + $0xd4] ss:$8 sps:$4 sm:$0xff]   ;;  %v819_v39 = vld [vmem:[#allocation7 + $0xd0] ss:$8 sps:$4 sm:$0xff]   ;;  %v820_v40 = vld [vmem:[#allocation7 + $0xc4] ss:$8 sps:$4 sm:$0xff]  }
  0x42   :  { %194 = vmatpush1.bf16.msra.mxu0 %v774_v8  ;;  %441 = vmatpush1.bf16.msra.mxu1 %v795_v18  ;;  %v822_v41 = vld [vmem:[#allocation7 + $0xc0] ss:$8 sps:$4 sm:$0xff]   ;;  %v823_v42 = vld [vmem:[#allocation7 + $0xb4] ss:$8 sps:$4 sm:$0xff]   ;;  %v825_v43 = vld [vmem:[#allocation7 + $0xb0] ss:$8 sps:$4 sm:$0xff]  }
  0x43   :  { %195 = vmatprep.subr.bf16.mxu0 %v775_v9  ;;  %442 = vmatprep.subr.bf16.mxu1 %v796_v19  ;;  %v826_v44 = vld [vmem:[#allocation7 + $0xa4] ss:$8 sps:$4 sm:$0xff]   ;;  %v828_v45 = vld [vmem:[#allocation7 + $0xa0] ss:$8 sps:$4 sm:$0xff]   ;;  %v829_v46 = vld [vmem:[#allocation7 + $0x94] ss:$8 sps:$4 sm:$0xff]  }
  0x44   :  { %v831_v47 = vld [vmem:[#allocation7 + $0x90] ss:$8 sps:$4 sm:$0xff]   ;;  %v832_v48 = vld [vmem:[#allocation7 + $0x84] ss:$8 sps:$4 sm:$0xff]   ;;  %v834_v49 = vld [vmem:[#allocation7 + $0x80] ss:$8 sps:$4 sm:$0xff]  }
  0x45   :  { %v835_v50 = vld [vmem:[#allocation8 + $0x78] sm:$0xff]   ;;  %v837_v52 = vld [vmem:[#allocation8 + $0x70] sm:$0xff]   ;;  %v840_v55 = vld [vmem:[#allocation8 + $0x28] sm:$0xff]   ;;  %v98_v63 = vshrl.u32 %v97_v62, 7  ;;  %s968_s20 = smov [#allocation10]  }
  0x46   :  { %196 = vmatpush1.bf16.msra.mxu0 %v777_v13  ;;  %443 = vmatpush1.bf16.msra.mxu1 %v798_v22  ;;  %v836_v51 = vld [vmem:[#allocation8 + $0x38] sm:$0xff]   ;;  %v838_v53 = vld [vmem:[#allocation8 + $0x30] sm:$0xff]   ;;  %v841_v56 = vld [vmem:[#allocation8 + $0x60] sm:$0xff]   ;;  %s656_s21 = sshll.u32 %s968_s20, 4  ;;  %s657_s21 = int_to_ptr.vmem [resolvable:$true] %s656_s21 }
  0x47   :  { %197 = vmatprep.subr.bf16.mxu0 %v778_v16  ;;  %444 = vmatprep.subr.bf16.mxu1 %v799_v23  ;;  %v842_v57 = vld [vmem:[#allocation8 + $0x20] sm:$0xff]   ;;  %v843_v58 = vld [vmem:[#allocation8 + $0x58] sm:$0xff]   ;;  %v845_v60 = vld [vmem:[#allocation8 + $0x50] sm:$0xff]   ;;  %v99_v0 = vsub.s32 0, %v98_v63  ;;  %v103_v2 = vsub.s32 1, %v98_v63  ;;  %p936_p7 = scmp.lt.s32.totalorder %s657_s21, %s657_s21 }
  0x48   :  { %v844_v59 = vld [vmem:[#allocation8 + $0x18] sm:$0xff]   ;;  %v846_v61 = vld [vmem:[#allocation8 + $0x10] sm:$0xff]   ;;  %v847_v15 = vld [vmem:[#allocation8 + $0x48] sm:$0xff]  }
  0x49   :  { %v95_v1 = vld [vmem:[%s1027_s2] sm:$0x3]  ;;  %v848_v16 = vld [vmem:[#allocation8 + $0x8] sm:$0xff]   ;;  %v850_v18 = vld [vmem:[#allocation8] sm:$0xff]  }
  0x4a   :  { %198 = vmatpush1.bf16.msra.mxu0 %v780_v17  ;;  %445 = vmatpush1.bf16.msra.mxu1 %v801_v26  ;;  %v100_v3 = vrot.slane %v95_v1, %v99_v0  ;;  %v104_v4 = vrot.slane %v95_v1, %v103_v2  ;;  %v849_v17 = vld [vmem:[#allocation8 + $0x40] sm:$0xff]   ;;  %v264_v19 = vld [vmem:[%s1029_s4] sm:$0x3]  ;;  %s931_s4 = scalar_lea.vmem %s657_s21, 128 }
  0x4b   :  { %199 = vmatprep.subr.bf16.mxu0 %v781_v20  ;;  %446 = vmatprep.subr.bf16.mxu1 %v802_v27  ;;  %v269_v20 = vrot.slane %v264_v19, %v99_v0  ;;  %p932_p6 = scmp.ne.s32.totalorder %s657_s21, %s931_s4  ;;  %p937_p8 = scmp.lt.s32.totalorder %s931_s4, %s931_s4 }
  0x4d   :  { %p938_p9 = por %p937_p8, %p936_p7 }
  0x4e   :  { %200 = vmatpush1.bf16.msra.mxu0 %v783_v21  ;;  %447 = vmatpush1.bf16.msra.mxu1 %v804_v29  ;;  %v273_v21 = vrot.slane %v264_v19, %v103_v2 }
  0x4f   :  { %201 = vmatprep.subr.bf16.mxu0 %v784_v24  ;;  %448 = vmatprep.subr.bf16.mxu1 %v805_v30  ;;  %p939_p10 = pnand %p938_p9, %p932_p6 }
  0x52   :  { %202 = vmatpush1.bf16.msra.mxu0 %v786_v25  ;;  %449 = vmatpush1.bf16.msra.mxu1 %v807_v31 }
  0x53   :  { %450 = vmatprep.subr.bf16.mxu1 %v808_v32  ;;  %731 = vmatprep.subr.bf16.mxu0 %v835_v50 }
  0x55   :  { %220 = vmatmul.mubr.bf16.vlgmr.msra.gmra.mxu0 %v78_v28 }
  0x56   :  { %451 = vmatpush1.bf16.msra.mxu1 %v810_v33  ;;  %732 = vmatpush3.bf16.msra.mxu0 %v836_v51 }
  0x57   :  { %452 = vmatprep.subr.bf16.mxu1 %v811_v34  ;;  %733 = vmatprep.subr.bf16.mxu0 %v837_v52 }
  0x5a   :  { %453 = vmatpush2.bf16.msra.mxu1 %v813_v35  ;;  %734 = vmatpush3.bf16.msra.mxu0 %v838_v53 }
  0x5b   :  { %454 = vmatprep.subr.bf16.mxu1 %v814_v36  ;;  %735 = vmatprep.subr.bf16.mxu0 %v839_v54 }
  0x5e   :  { %455 = vmatpush2.bf16.msra.mxu1 %v816_v37  ;;  %736 = vmatpush3.bf16.msra.mxu0 %v840_v55 }
  0x5f   :  { %456 = vmatprep.subr.bf16.mxu1 %v817_v38  ;;  %737 = vmatprep.subr.bf16.mxu0 %v841_v56 }
  0x62   :  { %457 = vmatpush2.bf16.msra.mxu1 %v819_v39  ;;  %738 = vmatpush3.bf16.msra.mxu0 %v842_v57 }
  0x63   :  { %458 = vmatprep.subr.bf16.mxu1 %v820_v40  ;;  %739 = vmatprep.subr.bf16.mxu0 %v843_v58 }
  0x66   :  { %459 = vmatpush2.bf16.msra.mxu1 %v822_v41  ;;  %740 = vmatpush3.bf16.msra.mxu0 %v844_v59 }
  0x67   :  { %460 = vmatprep.subr.bf16.mxu1 %v823_v42  ;;  %741 = vmatprep.subr.bf16.mxu0 %v845_v60 }
  0x6a   :  { %461 = vmatpush2.bf16.msra.mxu1 %v825_v43  ;;  %742 = vmatpush3.bf16.msra.mxu0 %v846_v61 }
  0x6b   :  { %462 = vmatprep.subr.bf16.mxu1 %v826_v44  ;;  %743 = vmatprep.subr.bf16.mxu0 %v847_v15 }
  0x6e   :  { %463 = vmatpush2.bf16.msra.mxu1 %v828_v45  ;;  %744 = vmatpush3.bf16.msra.mxu0 %v848_v16 }
  0x6f   :  { %464 = vmatprep.subr.bf16.mxu1 %v829_v46  ;;  %745 = vmatprep.subr.bf16.mxu0 %v849_v17 }
  0x72   :  { %465 = vmatpush2.bf16.msra.mxu1 %v831_v47  ;;  %746 = vmatpush3.bf16.msra.mxu0 %v850_v18 }
  0x73   :  { %466 = vmatprep.subr.bf16.mxu1 %v832_v48 }
  0x76   :  { %467 = vmatpush2.bf16.msra.mxu1 %v834_v49 }
 0x115   :  { %v221_v5 = vpop.f32.mrf.mxu0 }
 0x116   :  { %v222_v6 = vadd.f32 %v221_v5, %v100_v3 }
 0x117   :  { %v223_v7 = vpop.f32.mrf.mxu0 }
 0x118   :  { %v224_v8 = vadd.f32 %v223_v7, %v104_v4  ;;  %v228_v9 = vmax.f32 %v222_v6, 0.0 }
 0x119   :  { %v225_v10 = vpop.f32.mrf.mxu0 }
 0x11a   :  { %v229_v11 = vmax.f32 %v224_v8, 0.0  ;;  %v230_v14 = vpack.c.bf16 %v228_v9, %v228_v9 }
 0x11b   :  { %v226_v12 = vpop.f32.mrf.mxu0 }
 0x11c   :  { %v231_v13 = vpack.c.bf16 %v229_v11, %v229_v11 }
 0x11e   :  { %468 = vmatprep.mubr.bf16.mxu1 %v231_v13 }
 0x11f   :  { %469 = vmatmul.mubr.bf16.vlgmr.msra.gmra.mxu1 %v230_v14 }
 0x1df   :  { %v470_v22 = vpop.f32.mrf.mxu1 }
 0x1e0   :  { %v471_v23 = vadd.f32 %v470_v22, %v269_v20 }
 0x1e1   :  { %v472_v24 = vpop.f32.mrf.mxu1 }
 0x1e2   :  { %v473_v25 = vadd.f32 %v472_v24, %v273_v21  ;;  %v477_v26 = vmax.f32 %v471_v23, 0.0 }
 0x1e3   :  { %v474_v27 = vpop.f32.mrf.mxu1 }
 0x1e4   :  { %v478_v28 = vmax.f32 %v473_v25, 0.0  ;;  %v479_v31 = vpack.c.bf16 %v477_v26, %v477_v26 }
 0x1e5   :  { %v475_v29 = vpop.f32.mrf.mxu1 }
 0x1e6   :  { %v480_v30 = vpack.c.bf16 %v478_v28, %v478_v28 }
 0x1e8   :  { %641 = vmatprep.mubr.bf16.mxu0 %v480_v30 }
 0x1e9   :  { %642 = vmatmul.mubr.bf16.vlgmr.msra.gmra.mxu0 %v479_v31 }
 0x2a9   :  { %v747_v32 = vpop.f32.mrf.mxu0 }
 0x2ab   :  { %v748_v33 = vpop.f32.mrf.mxu0 }
 0x2ac   :  { %v749_v34 = vadd.f32 %v748_v33, %v747_v32 }
 0x2ad   :  { %v750_v35 = vpop.f32.mrf.mxu0 }
 0x2ae   :  { %649 = vst [vmem:[#allocation10] sm:$0xff] %v749_v34 }
 0x2af   :  { %v751_v36 = vpop.f32.mrf.mxu0 }
 0x2b0   :  { %942 = shalt.err (!%p939_p10)
}
 0x2b1   :  { %659 = dma.vmem_to_hbm [thread:$0]  %s657_s21, 128, %s1031_s6, [#allocation4]  }
 0x2b2   :  { %957 = dma.done.wait [#allocation4], 128  }
 0x2b3   :  { %958 = vsyncadd [#allocation4], 4294967168 }
 0x2b4   :  { %663 = vsyncpa [#allocation3], 1 }
 0x2b5   :  { %664 = vsyncpa [#allocation6], 1 }
 0x2b6   :  { %665 = vsyncpa [#allocation9], 1 }
 0x2b7   :  { %666 = vsyncpa [#allocation4], 1 }

</bundles_post_ra>
